<compile_context>
chip_gen: v7x
topology: tpu7x:2x2x1
jax: 0.10.0
libtpu: 0.0.40
codegen_flags: <defaults>
</compile_context>

<pallas_src>
import functools

import jax
import jax.numpy as jnp
from jax import lax
from jax.experimental import pallas as pl
from jax.experimental.pallas import tpu as pltpu

_EPS = 1e-5      # nn.BatchNorm1d default eps
_LEAD = 8        # zero rows at the head of every activation slab


# ------------------------------ fused kernel ------------------------------- #
def _encoder_kernel(x_ref, p_ref, out_ref, *act_refs,
                    batch, c_pad, layers, alpha_off):
    """Fused Conv1d(k=3,s=2,p=1) [+BN(train) +shared PReLU] stack.

    Slab layout (per activation slab, shape (_LEAD + B*S, c_pad)):
      padded-signal index t of batch b lives at row _LEAD + b*S + t - 1, so the
      leading conv pad of batch b is either a lead zero row (b=0) or the masked
      last row of batch b-1's group.  S is a power of two, hence a single
      stride-2 read starting at row _LEAD-1+k yields ALL batches' k-th taps.
    """
    n = len(layers)
    a_row = p_ref[pl.ds(alpha_off, 1), :]                # (1, C) shared PReLU

    src = x_ref
    for i, (w_off, aux_off, g, l_out) in enumerate(layers):
        last = i == n - 1
        rows = batch * g                                 # g = S_i // 2

        # Conv as 3 batched stride-2 sublane reads + 3 accumulating matmuls.
        acc = None
        for k in range(3):
            tap = src[pl.ds(_LEAD - 1 + k, rows, stride=2), :]     # (rows, C)
            wk = p_ref[pl.ds(w_off + k * c_pad, c_pad), :]         # (C, C)
            d = jnp.dot(tap, wk, preferred_element_type=jnp.float32)
            acc = d if acc is None else acc + d

        if last:
            bias = p_ref[pl.ds(aux_off, 1), :]                     # (1, C)
            out_ref[...] = (acc + bias).astype(out_ref.dtype)
        else:
            # Rows >= l_out inside each per-batch group are junk (they read
            # past the real signal); zero them so they drop out of the BN
            # stats AND become the next layer's conv zero-padding.
            ridx = lax.broadcasted_iota(jnp.int32, (rows, 1), 0)
            mask = (ridx & (g - 1)) < l_out              # g is a power of two
            y = jnp.where(mask, acc, 0.0)

            # BatchNorm1d (training mode, biased stats over B*l_out rows)
            # folded into one scale/shift.  Conv bias intentionally omitted:
            # it is exactly cancelled by the mean subtraction.
            cnt = float(batch * l_out)
            s1 = jnp.sum(y, axis=0, keepdims=True)
            s2 = jnp.sum(y * y, axis=0, keepdims=True)
            mean = s1 / cnt
            var = s2 / cnt - mean * mean
            gb = p_ref[pl.ds(aux_off, 2), :]                       # (2, C)
            scale = gb[0:1, :] * lax.rsqrt(var + _EPS)
            shift = gb[1:2, :] - mean * scale

            act = y * scale + shift
            act = jnp.where(act > 0, act, a_row * act)   # shared PReLU slope
            act = jnp.where(mask, act, 0.0)              # keep pad rows zero

            dst = act_refs[i]
            dst[pl.ds(0, _LEAD), :] = jnp.zeros((_LEAD, c_pad), jnp.float32)
            dst[pl.ds(_LEAD, rows), :] = act             # one aligned store
            src = dst


# ------------------------- parameters (deterministic) ---------------------- #
def init_encoder_params(key, n_channels=10, n_kernels=16, n_layers=3):
    """Replicates the Encoder channel plan; deterministic synthetic init."""
    out_chans = [n_kernels // 2 ** (n_layers - 1 - l) for l in range(n_layers)]
    in_chans = [n_channels] + out_chans[:-1]
    layers = []
    for c_in, c_out in zip(in_chans, out_chans):
        key, kw, kb = jax.random.split(key, 3)
        fan_in, fan_out = c_in * 3, c_out * 3
        limit = (6.0 / (fan_in + fan_out)) ** 0.5
        v = jax.random.uniform(kw, (c_out, c_in, 3), jnp.float32, -limit, limit)
        g = jnp.sqrt(jnp.sum(v ** 2, axis=(1, 2)))      # weight_norm: g=||v||
        b_bound = 1.0 / (fan_in ** 0.5)
        b = jax.random.uniform(kb, (c_out,), jnp.float32, -b_bound, b_bound)
        gamma = jnp.ones((c_out,), jnp.float32)          # BatchNorm weight
        beta = jnp.zeros((c_out,), jnp.float32)          # BatchNorm bias
        layers.append((v, g, b, gamma, beta))
    # nn.PReLU() default-arg in Conv1D => ONE slope shared by all blocks.
    a = jnp.array(0.25, jnp.float32)
    return layers, a


def prepare_params(params):
    """Run-once host prep: fold weight_norm, pad channels and pack EVERYTHING
    (conv weights, BN gamma/beta, last bias, PReLU slope) into one f32 slab.

    TODO(synk): the PyTorch post-weight_norm xavier re-init writes a tensor
    that the weight_norm hook overwrites on forward; it is not reproduced.
    """
    layers, alpha = params
    n = len(layers)
    c_pad = 0
    for v, _, _, _, _ in layers:
        c_out, c_in, _ = v.shape
        c_pad = max(c_pad, c_in, c_out)

    def pad8(m):
        return jnp.pad(m, ((0, (-m.shape[0]) % 8), (0, 0)))

    blocks, w_offs, aux_offs, c_outs = [], [], [], []
    row = 0

    def push(block):
        nonlocal row
        off = row
        block = pad8(block.astype(jnp.float32))
        blocks.append(block)
        row += block.shape[0]
        return off

    for i, (v, g, b, gamma, beta) in enumerate(layers):
        c_out, c_in, _ = v.shape
        c_outs.append(c_out)
        # weight_norm fold: w = g * v / ||v||          -> (c_out, c_in, 3)
        norm = jnp.sqrt(jnp.sum(v ** 2, axis=(1, 2), keepdims=True))
        w = g.reshape(-1, 1, 1) * v / norm
        # (c_out, c_in, 3) -> (3*c_pad, c_pad); row index = k*c_pad + c_in_idx.
        wp = jnp.pad(jnp.transpose(w, (2, 1, 0)),
                     ((0, 0), (0, c_pad - c_in), (0, c_pad - c_out)))
        w_offs.append(push(wp.reshape(3 * c_pad, c_pad)))
        if i < n - 1:
            # Conv bias dropped: cancelled exactly by train-mode BN mean sub.
            gb = jnp.stack([jnp.pad(gamma, (0, c_pad - c_out)),
                            jnp.pad(beta, (0, c_pad - c_out))], axis=0)
            aux_offs.append(push(gb))
        else:
            aux_offs.append(push(jnp.pad(b, (0, c_pad - c_out)).reshape(1, c_pad)))
    alpha_off = push(jnp.full((1, c_pad), alpha, jnp.float32))

    packed = jnp.concatenate(blocks, axis=0)
    layout = dict(n_layers=n, c_pad=c_pad, w_offs=tuple(w_offs),
                  aux_offs=tuple(aux_offs), alpha_off=alpha_off,
                  c_outs=tuple(c_outs))
    return packed, layout


# ------------------------------- Encoder ----------------------------------- #
def encoder_forward(packed, x_ncl, layout):
    """x_ncl: (B, n_channels, seq) like the PyTorch module. Returns NCL feats."""
    assert x_ncl.ndim == 3
    n = layout["n_layers"]
    c_pad = layout["c_pad"]
    B, C0, L0 = x_ncl.shape
    assert C0 <= c_pad

    # Static per-layer plan: lengths and power-of-two per-batch slab strides S.
    l_ins, l_outs, l = [], [], L0
    for _ in range(n):
        l_ins.append(l)
        l = (l - 1) // 2 + 1
        l_outs.append(l)
    s_last = max(8, pl.next_power_of_2(max(l_ins[-1] + 2, 2 * l_outs[-1] + 2)))
    S = [s_last << (n - 1 - i) for i in range(n)]
    G = [s // 2 for s in S]
    for i in range(n):
        assert S[i] >= max(l_ins[i] + 1, 2 * l_outs[i] + 2)
        assert G[i] & (G[i] - 1) == 0

    # Host glue (one fused transform): NCL -> channels-last, channel-padded,
    # per-batch stride S[0], plus _LEAD zero rows.
    x = jnp.transpose(x_ncl, (0, 2, 1)).astype(jnp.float32)
    x = jnp.pad(x, ((0, 0), (0, S[0] - L0), (0, c_pad - C0)))
    x = jnp.pad(x.reshape(B * S[0], c_pad), ((_LEAD, 0), (0, 0)))

    layer_cfg = tuple((layout["w_offs"][i], layout["aux_offs"][i], G[i], l_outs[i])
                      for i in range(n))
    scratch = [pltpu.VMEM((_LEAD + B * S[i], c_pad), jnp.float32)
               for i in range(1, n)]
    out_rows = B * G[-1]

    vmem = pl.BlockSpec(memory_space=pltpu.MemorySpace.VMEM)
    footprint = 4 * (x.size + packed.size + out_rows * c_pad
                     + sum((_LEAD + B * S[i]) * c_pad for i in range(1, n)))
    flops = sum(2 * B * G[i] * (3 * c_pad) * c_pad for i in range(n))

    kern = functools.partial(_encoder_kernel, batch=B, c_pad=c_pad,
                             layers=layer_cfg, alpha_off=layout["alpha_off"])
    y2d = pl.pallas_call(
        kern,
        out_shape=jax.ShapeDtypeStruct((out_rows, c_pad), jnp.float32),
        in_specs=[vmem, vmem],
        out_specs=vmem,
        scratch_shapes=scratch,
        compiler_params=pltpu.CompilerParams(
            vmem_limit_bytes=int(2 * footprint) + (1 << 20)),
        cost_estimate=pl.CostEstimate(flops=int(flops), transcendentals=0,
                                      bytes_accessed=int(footprint)),
    )(x, packed)

    c_last = layout["c_outs"][-1]
    y = y2d.reshape(B, G[-1], c_pad)[:, :l_outs[-1], :c_last]
    return jnp.transpose(y, (0, 2, 1))                   # back to NCL


# --------------------------- pure-JAX reference ----------------------------- #
def _reference_forward(params, x_ncl):
    layers, a = params
    x = x_ncl.astype(jnp.float32)
    n = len(layers)
    for i, (v, g, b, gamma, beta) in enumerate(layers):
        norm = jnp.sqrt(jnp.sum(v ** 2, axis=(1, 2), keepdims=True))
        w = g.reshape(-1, 1, 1) * v / norm
        y = lax.conv_general_dilated(
            x, w, window_strides=(2,), padding=[(1, 1)],
            dimension_numbers=("NCH", "OIH", "NCH"))
        y = y + b.reshape(1, -1, 1)
        if i < n - 1:
            mean = jnp.mean(y, axis=(0, 2), keepdims=True)
            var = jnp.mean((y - mean) ** 2, axis=(0, 2), keepdims=True)
            y = (y - mean) / jnp.sqrt(var + _EPS)
            y = y * gamma.reshape(1, -1, 1) + beta.reshape(1, -1, 1)
            y = jnp.where(y > 0, y, a * y)
        x = y
    return x


if __name__ == "__main__":
    key = jax.random.PRNGKey(0)
    key, kx = jax.random.split(key)

    # Module defaults (small): batch=2, n_channels=10, n_kernels=16,
    # n_layers=3, seq_size=50.
    B, n_channels, n_kernels, n_layers, seq = 2, 10, 16, 3, 50
    x = jax.random.normal(kx, (B, n_channels, seq), jnp.float32)

    params = init_encoder_params(key, n_channels, n_kernels, n_layers)
    packed, layout = prepare_params(params)          # hoisted, run once

    fwd = jax.jit(functools.partial(encoder_forward, layout=layout))
    out = jax.block_until_ready(fwd(packed, x))

    feat_size = (seq - 1) // 2 ** n_layers + 1
    assert out.shape == (B, n_kernels, feat_size), out.shape

    ref = jax.block_until_ready(_reference_forward(params, x))
    assert jnp.allclose(out, ref, rtol=1e-3, atol=1e-3), float(
        jnp.max(jnp.abs(out - ref)))

    print("KERNEL_OK")
</pallas_src>

<mosaic_0001>
module attributes {stable_mosaic.version = 11 : i64} {
  func.func @_encoder_kernel(%arg0: memref<136x16xf32, #tpu.memory_space<vmem>>, %arg1: memref<176x16xf32, #tpu.memory_space<vmem>>, %arg2: memref<16x16xf32, #tpu.memory_space<vmem>>, %arg3: memref<72x16xf32, #tpu.memory_space<vmem>>, %arg4: memref<40x16xf32, #tpu.memory_space<vmem>>) attributes {dimension_semantics = [], scalar_prefetch = 0 : i64, scratch_operands = 2 : i64, tpu.core_type = #tpu.core_type<tc>} {
    %c168 = arith.constant 168 : index
    %c0 = arith.constant 0 : index
    %0 = vector.load %arg1[%c168, %c0] : memref<176x16xf32, #tpu.memory_space<vmem>>, vector<1x16xf32>
    %c7 = arith.constant 7 : index
    %c0_0 = arith.constant 0 : index
    %1 = tpu.strided_load %arg0[%c7, %c0_0] {strides = array<i32: 2, 1>} : memref<136x16xf32, #tpu.memory_space<vmem>>, vector<64x16xf32>
    %c0_1 = arith.constant 0 : index
    %c0_2 = arith.constant 0 : index
    %2 = vector.load %arg1[%c0_1, %c0_2] : memref<176x16xf32, #tpu.memory_space<vmem>>, vector<16x16xf32>
    %cst = arith.constant dense<0.000000e+00> : vector<64x16xf32>
    %3 = tpu.matmul %1, %2, %cst {dimension_numbers = #tpu.dot_dimension_numbers<[1], [0], [0], [1], [0, 0, 1, 1], [], []>} : vector<64x16xf32>, vector<16x16xf32>, vector<64x16xf32> -> vector<64x16xf32>
    %c8 = arith.constant 8 : index
    %c0_3 = arith.constant 0 : index
    %4 = tpu.strided_load %arg0[%c8, %c0_3] {strides = array<i32: 2, 1>} : memref<136x16xf32, #tpu.memory_space<vmem>>, vector<64x16xf32>
    %c16 = arith.constant 16 : index
    %c0_4 = arith.constant 0 : index
    %5 = vector.load %arg1[%c16, %c0_4] : memref<176x16xf32, #tpu.memory_space<vmem>>, vector<16x16xf32>
    %cst_5 = arith.constant dense<0.000000e+00> : vector<64x16xf32>
    %6 = tpu.matmul %4, %5, %cst_5 {dimension_numbers = #tpu.dot_dimension_numbers<[1], [0], [0], [1], [0, 0, 1, 1], [], []>} : vector<64x16xf32>, vector<16x16xf32>, vector<64x16xf32> -> vector<64x16xf32>
    %7 = arith.addf %3, %6 : vector<64x16xf32>
    %c9 = arith.constant 9 : index
    %c0_6 = arith.constant 0 : index
    %8 = tpu.strided_load %arg0[%c9, %c0_6] {strides = array<i32: 2, 1>} : memref<136x16xf32, #tpu.memory_space<vmem>>, vector<64x16xf32>
    %c32 = arith.constant 32 : index
    %c0_7 = arith.constant 0 : index
    %9 = vector.load %arg1[%c32, %c0_7] : memref<176x16xf32, #tpu.memory_space<vmem>>, vector<16x16xf32>
    %cst_8 = arith.constant dense<0.000000e+00> : vector<64x16xf32>
    %10 = tpu.matmul %8, %9, %cst_8 {dimension_numbers = #tpu.dot_dimension_numbers<[1], [0], [0], [1], [0, 0, 1, 1], [], []>} : vector<64x16xf32>, vector<16x16xf32>, vector<64x16xf32> -> vector<64x16xf32>
    %11 = arith.addf %7, %10 : vector<64x16xf32>
    %12 = tpu.iota {dimensions = array<i32: 0>} : vector<64x1xi32>
    %c31_i32 = arith.constant 31 : i32
    %13 = vector.broadcast %c31_i32 : i32 to vector<64x1xi32>
    %14 = arith.andi %12, %13 : vector<64x1xi32>
    %c25_i32 = arith.constant 25 : i32
    %15 = vector.broadcast %c25_i32 : i32 to vector<64x1xi32>
    %16 = arith.cmpi slt, %14, %15 : vector<64x1xi32>
    %cst_9 = arith.constant 0.000000e+00 : f32
    %17 = vector.shape_cast %16 : vector<64x1xi1> to vector<64x1xi1>
    %18 = vector.broadcast %17 : vector<64x1xi1> to vector<64x16xi1>
    %19 = vector.broadcast %cst_9 : f32 to vector<64x16xf32>
    %20 = arith.select %18, %11, %19 : vector<64x16xi1>, vector<64x16xf32>
    %cst_10 = arith.constant dense<0.000000e+00> : vector<16xf32>
    %21 = vector.multi_reduction <add>, %20, %cst_10 [0] : vector<64x16xf32> to vector<16xf32>
    %22 = vector.shape_cast %21 : vector<16xf32> to vector<1x16xf32>
    %23 = arith.mulf %20, %20 : vector<64x16xf32>
    %cst_11 = arith.constant dense<0.000000e+00> : vector<16xf32>
    %24 = vector.multi_reduction <add>, %23, %cst_11 [0] : vector<64x16xf32> to vector<16xf32>
    %25 = vector.shape_cast %24 : vector<16xf32> to vector<1x16xf32>
    %cst_12 = arith.constant 5.000000e+01 : f32
    %26 = vector.broadcast %cst_12 : f32 to vector<1x16xf32>
    %27 = arith.divf %22, %26 : vector<1x16xf32>
    %cst_13 = arith.constant 5.000000e+01 : f32
    %28 = vector.broadcast %cst_13 : f32 to vector<1x16xf32>
    %29 = arith.divf %25, %28 : vector<1x16xf32>
    %30 = arith.mulf %27, %27 : vector<1x16xf32>
    %31 = arith.subf %29, %30 : vector<1x16xf32>
    %c48 = arith.constant 48 : index
    %c0_14 = arith.constant 0 : index
    %32 = vector.load %arg1[%c48, %c0_14] : memref<176x16xf32, #tpu.memory_space<vmem>>, vector<2x16xf32>
    %33 = vector.extract_strided_slice %32 {offsets = [0, 0], sizes = [1, 16], strides = [1, 1]} : vector<2x16xf32> to vector<1x16xf32>
    %cst_15 = arith.constant 9.99999974E-6 : f32
    %34 = vector.broadcast %cst_15 : f32 to vector<1x16xf32>
    %35 = arith.addf %31, %34 : vector<1x16xf32>
    %36 = math.rsqrt %35 : vector<1x16xf32>
    %37 = arith.mulf %33, %36 : vector<1x16xf32>
    %38 = vector.extract_strided_slice %32 {offsets = [1, 0], sizes = [1, 16], strides = [1, 1]} : vector<2x16xf32> to vector<1x16xf32>
    %39 = arith.mulf %27, %37 : vector<1x16xf32>
    %40 = arith.subf %38, %39 : vector<1x16xf32>
    %41 = vector.broadcast %37 : vector<1x16xf32> to vector<64x16xf32>
    %42 = arith.mulf %20, %41 : vector<64x16xf32>
    %43 = vector.broadcast %40 : vector<1x16xf32> to vector<64x16xf32>
    %44 = arith.addf %42, %43 : vector<64x16xf32>
    %cst_16 = arith.constant 0.000000e+00 : f32
    %45 = vector.broadcast %cst_16 : f32 to vector<64x16xf32>
    %46 = arith.cmpf ogt, %44, %45 : vector<64x16xf32>
    %47 = vector.broadcast %0 : vector<1x16xf32> to vector<64x16xf32>
    %48 = arith.mulf %47, %44 : vector<64x16xf32>
    %49 = arith.select %46, %44, %48 : vector<64x16xi1>, vector<64x16xf32>
    %cst_17 = arith.constant 0.000000e+00 : f32
    %50 = vector.shape_cast %16 : vector<64x1xi1> to vector<64x1xi1>
    %51 = vector.broadcast %50 : vector<64x1xi1> to vector<64x16xi1>
    %52 = vector.broadcast %cst_17 : f32 to vector<64x16xf32>
    %53 = arith.select %51, %49, %52 : vector<64x16xi1>, vector<64x16xf32>
    %cst_18 = arith.constant 0.000000e+00 : f32
    %54 = vector.broadcast %cst_18 : f32 to vector<8x16xf32>
    %c0_19 = arith.constant 0 : index
    %c0_20 = arith.constant 0 : index
    %55 = vector.load %arg3[%c0_19, %c0_20] : memref<72x16xf32, #tpu.memory_space<vmem>>, vector<8x16xf32>
    tpu.vector_store %arg3[%c0_19, %c0_20], %54 {strides = array<i32>} : memref<72x16xf32, #tpu.memory_space<vmem>>, vector<8x16xf32>,
    %c8_21 = arith.constant 8 : index
    %c0_22 = arith.constant 0 : index
    %56 = vector.load %arg3[%c8_21, %c0_22] : memref<72x16xf32, #tpu.memory_space<vmem>>, vector<64x16xf32>
    tpu.vector_store %arg3[%c8_21, %c0_22], %53 {strides = array<i32>} : memref<72x16xf32, #tpu.memory_space<vmem>>, vector<64x16xf32>,
    %c7_23 = arith.constant 7 : index
    %c0_24 = arith.constant 0 : index
    %57 = tpu.strided_load %arg3[%c7_23, %c0_24] {strides = array<i32: 2, 1>} : memref<72x16xf32, #tpu.memory_space<vmem>>, vector<32x16xf32>
    %c56 = arith.constant 56 : index
    %c0_25 = arith.constant 0 : index
    %58 = vector.load %arg1[%c56, %c0_25] : memref<176x16xf32, #tpu.memory_space<vmem>>, vector<16x16xf32>
    %cst_26 = arith.constant dense<0.000000e+00> : vector<32x16xf32>
    %59 = tpu.matmul %57, %58, %cst_26 {dimension_numbers = #tpu.dot_dimension_numbers<[1], [0], [0], [1], [0, 0, 1, 1], [], []>} : vector<32x16xf32>, vector<16x16xf32>, vector<32x16xf32> -> vector<32x16xf32>
    %c8_27 = arith.constant 8 : index
    %c0_28 = arith.constant 0 : index
    %60 = tpu.strided_load %arg3[%c8_27, %c0_28] {strides = array<i32: 2, 1>} : memref<72x16xf32, #tpu.memory_space<vmem>>, vector<32x16xf32>
    %c72 = arith.constant 72 : index
    %c0_29 = arith.constant 0 : index
    %61 = vector.load %arg1[%c72, %c0_29] : memref<176x16xf32, #tpu.memory_space<vmem>>, vector<16x16xf32>
    %cst_30 = arith.constant dense<0.000000e+00> : vector<32x16xf32>
    %62 = tpu.matmul %60, %61, %cst_30 {dimension_numbers = #tpu.dot_dimension_numbers<[1], [0], [0], [1], [0, 0, 1, 1], [], []>} : vector<32x16xf32>, vector<16x16xf32>, vector<32x16xf32> -> vector<32x16xf32>
    %63 = arith.addf %59, %62 : vector<32x16xf32>
    %c9_31 = arith.constant 9 : index
    %c0_32 = arith.constant 0 : index
    %64 = tpu.strided_load %arg3[%c9_31, %c0_32] {strides = array<i32: 2, 1>} : memref<72x16xf32, #tpu.memory_space<vmem>>, vector<32x16xf32>
    %c88 = arith.constant 88 : index
    %c0_33 = arith.constant 0 : index
    %65 = vector.load %arg1[%c88, %c0_33] : memref<176x16xf32, #tpu.memory_space<vmem>>, vector<16x16xf32>
    %cst_34 = arith.constant dense<0.000000e+00> : vector<32x16xf32>
    %66 = tpu.matmul %64, %65, %cst_34 {dimension_numbers = #tpu.dot_dimension_numbers<[1], [0], [0], [1], [0, 0, 1, 1], [], []>} : vector<32x16xf32>, vector<16x16xf32>, vector<32x16xf32> -> vector<32x16xf32>
    %67 = arith.addf %63, %66 : vector<32x16xf32>
    %68 = tpu.iota {dimensions = array<i32: 0>} : vector<32x1xi32>
    %c15_i32 = arith.constant 15 : i32
    %69 = vector.broadcast %c15_i32 : i32 to vector<32x1xi32>
    %70 = arith.andi %68, %69 : vector<32x1xi32>
    %c13_i32 = arith.constant 13 : i32
    %71 = vector.broadcast %c13_i32 : i32 to vector<32x1xi32>
    %72 = arith.cmpi slt, %70, %71 : vector<32x1xi32>
    %cst_35 = arith.constant 0.000000e+00 : f32
    %73 = vector.shape_cast %72 : vector<32x1xi1> to vector<32x1xi1>
    %74 = vector.broadcast %73 : vector<32x1xi1> to vector<32x16xi1>
    %75 = vector.broadcast %cst_35 : f32 to vector<32x16xf32>
    %76 = arith.select %74, %67, %75 : vector<32x16xi1>, vector<32x16xf32>
    %cst_36 = arith.constant dense<0.000000e+00> : vector<16xf32>
    %77 = vector.multi_reduction <add>, %76, %cst_36 [0] : vector<32x16xf32> to vector<16xf32>
    %78 = vector.shape_cast %77 : vector<16xf32> to vector<1x16xf32>
    %79 = arith.mulf %76, %76 : vector<32x16xf32>
    %cst_37 = arith.constant dense<0.000000e+00> : vector<16xf32>
    %80 = vector.multi_reduction <add>, %79, %cst_37 [0] : vector<32x16xf32> to vector<16xf32>
    %81 = vector.shape_cast %80 : vector<16xf32> to vector<1x16xf32>
    %cst_38 = arith.constant 2.600000e+01 : f32
    %82 = vector.broadcast %cst_38 : f32 to vector<1x16xf32>
    %83 = arith.divf %78, %82 : vector<1x16xf32>
    %cst_39 = arith.constant 2.600000e+01 : f32
    %84 = vector.broadcast %cst_39 : f32 to vector<1x16xf32>
    %85 = arith.divf %81, %84 : vector<1x16xf32>
    %86 = arith.mulf %83, %83 : vector<1x16xf32>
    %87 = arith.subf %85, %86 : vector<1x16xf32>
    %c104 = arith.constant 104 : index
    %c0_40 = arith.constant 0 : index
    %88 = vector.load %arg1[%c104, %c0_40] : memref<176x16xf32, #tpu.memory_space<vmem>>, vector<2x16xf32>
    %89 = vector.extract_strided_slice %88 {offsets = [0, 0], sizes = [1, 16], strides = [1, 1]} : vector<2x16xf32> to vector<1x16xf32>
    %cst_41 = arith.constant 9.99999974E-6 : f32
    %90 = vector.broadcast %cst_41 : f32 to vector<1x16xf32>
    %91 = arith.addf %87, %90 : vector<1x16xf32>
    %92 = math.rsqrt %91 : vector<1x16xf32>
    %93 = arith.mulf %89, %92 : vector<1x16xf32>
    %94 = vector.extract_strided_slice %88 {offsets = [1, 0], sizes = [1, 16], strides = [1, 1]} : vector<2x16xf32> to vector<1x16xf32>
    %95 = arith.mulf %83, %93 : vector<1x16xf32>
    %96 = arith.subf %94, %95 : vector<1x16xf32>
    %97 = vector.broadcast %93 : vector<1x16xf32> to vector<32x16xf32>
    %98 = arith.mulf %76, %97 : vector<32x16xf32>
    %99 = vector.broadcast %96 : vector<1x16xf32> to vector<32x16xf32>
    %100 = arith.addf %98, %99 : vector<32x16xf32>
    %cst_42 = arith.constant 0.000000e+00 : f32
    %101 = vector.broadcast %cst_42 : f32 to vector<32x16xf32>
    %102 = arith.cmpf ogt, %100, %101 : vector<32x16xf32>
    %103 = vector.broadcast %0 : vector<1x16xf32> to vector<32x16xf32>
    %104 = arith.mulf %103, %100 : vector<32x16xf32>
    %105 = arith.select %102, %100, %104 : vector<32x16xi1>, vector<32x16xf32>
    %cst_43 = arith.constant 0.000000e+00 : f32
    %106 = vector.shape_cast %72 : vector<32x1xi1> to vector<32x1xi1>
    %107 = vector.broadcast %106 : vector<32x1xi1> to vector<32x16xi1>
    %108 = vector.broadcast %cst_43 : f32 to vector<32x16xf32>
    %109 = arith.select %107, %105, %108 : vector<32x16xi1>, vector<32x16xf32>
    %cst_44 = arith.constant 0.000000e+00 : f32
    %110 = vector.broadcast %cst_44 : f32 to vector<8x16xf32>
    %c0_45 = arith.constant 0 : index
    %c0_46 = arith.constant 0 : index
    %111 = vector.load %arg4[%c0_45, %c0_46] : memref<40x16xf32, #tpu.memory_space<vmem>>, vector<8x16xf32>
    tpu.vector_store %arg4[%c0_45, %c0_46], %110 {strides = array<i32>} : memref<40x16xf32, #tpu.memory_space<vmem>>, vector<8x16xf32>,
    %c8_47 = arith.constant 8 : index
    %c0_48 = arith.constant 0 : index
    %112 = vector.load %arg4[%c8_47, %c0_48] : memref<40x16xf32, #tpu.memory_space<vmem>>, vector<32x16xf32>
    tpu.vector_store %arg4[%c8_47, %c0_48], %109 {strides = array<i32>} : memref<40x16xf32, #tpu.memory_space<vmem>>, vector<32x16xf32>,
    %c7_49 = arith.constant 7 : index
    %c0_50 = arith.constant 0 : index
    %113 = tpu.strided_load %arg4[%c7_49, %c0_50] {strides = array<i32: 2, 1>} : memref<40x16xf32, #tpu.memory_space<vmem>>, vector<16x16xf32>
    %c112 = arith.constant 112 : index
    %c0_51 = arith.constant 0 : index
    %114 = vector.load %arg1[%c112, %c0_51] : memref<176x16xf32, #tpu.memory_space<vmem>>, vector<16x16xf32>
    %cst_52 = arith.constant dense<0.000000e+00> : vector<16x16xf32>
    %115 = tpu.matmul %113, %114, %cst_52 {dimension_numbers = #tpu.dot_dimension_numbers<[1], [0], [0], [1], [0, 0, 1, 1], [], []>} : vector<16x16xf32>, vector<16x16xf32>, vector<16x16xf32> -> vector<16x16xf32>
    %c8_53 = arith.constant 8 : index
    %c0_54 = arith.constant 0 : index
    %116 = tpu.strided_load %arg4[%c8_53, %c0_54] {strides = array<i32: 2, 1>} : memref<40x16xf32, #tpu.memory_space<vmem>>, vector<16x16xf32>
    %c128 = arith.constant 128 : index
    %c0_55 = arith.constant 0 : index
    %117 = vector.load %arg1[%c128, %c0_55] : memref<176x16xf32, #tpu.memory_space<vmem>>, vector<16x16xf32>
    %cst_56 = arith.constant dense<0.000000e+00> : vector<16x16xf32>
    %118 = tpu.matmul %116, %117, %cst_56 {dimension_numbers = #tpu.dot_dimension_numbers<[1], [0], [0], [1], [0, 0, 1, 1], [], []>} : vector<16x16xf32>, vector<16x16xf32>, vector<16x16xf32> -> vector<16x16xf32>
    %119 = arith.addf %115, %118 : vector<16x16xf32>
    %c9_57 = arith.constant 9 : index
    %c0_58 = arith.constant 0 : index
    %120 = tpu.strided_load %arg4[%c9_57, %c0_58] {strides = array<i32: 2, 1>} : memref<40x16xf32, #tpu.memory_space<vmem>>, vector<16x16xf32>
    %c144 = arith.constant 144 : index
    %c0_59 = arith.constant 0 : index
    %121 = vector.load %arg1[%c144, %c0_59] : memref<176x16xf32, #tpu.memory_space<vmem>>, vector<16x16xf32>
    %cst_60 = arith.constant dense<0.000000e+00> : vector<16x16xf32>
    %122 = tpu.matmul %120, %121, %cst_60 {dimension_numbers = #tpu.dot_dimension_numbers<[1], [0], [0], [1], [0, 0, 1, 1], [], []>} : vector<16x16xf32>, vector<16x16xf32>, vector<16x16xf32> -> vector<16x16xf32>
    %123 = arith.addf %119, %122 : vector<16x16xf32>
    %c160 = arith.constant 160 : index
    %c0_61 = arith.constant 0 : index
    %124 = vector.load %arg1[%c160, %c0_61] : memref<176x16xf32, #tpu.memory_space<vmem>>, vector<1x16xf32>
    %125 = vector.broadcast %124 : vector<1x16xf32> to vector<16x16xf32>
    %126 = arith.addf %123, %125 : vector<16x16xf32>
    %c0_62 = arith.constant 0 : index
    %c0_63 = arith.constant 0 : index
    %127 = vector.load %arg2[%c0_62, %c0_63] : memref<16x16xf32, #tpu.memory_space<vmem>>, vector<16x16xf32>
    tpu.vector_store %arg2[%c0_62, %c0_63], %126 {strides = array<i32>} : memref<16x16xf32, #tpu.memory_space<vmem>>, vector<16x16xf32>,
    return
  }
}

</mosaic_0001>

<bundles_post_ra>
// kernel: encoder_forward.1
= control target key start
LH: loop header
LB: loop body
LE: loop exit
PB: predicated region body
PF: predicated region fallthrough
CT: control target
= control target key end

     0   :  { %vm48_vm0 = vcmask 130048   ;;  %v1644_v36 = vmov 0.0   ;;  %v462_v42 = vlaneseq  ;;  %s1989_s1 = inlined_call_operand.vmem [shape: f32[176,16], index: 1, kind: input, shape index: {}]   ;;  %s1990_s0 = inlined_call_operand.vmem [shape: f32[136,16], index: 0, kind: input, shape index: {}]   ;;  %s1991_s2 = inlined_call_operand.vmem [shape: f32[16,16], index: 2, kind: output, shape index: {}]  }
   0x1   :  { %v46_v0 = vld [vmem:[%s1989_s1 + $0x10] sm:$0xff]  ;;  %v47_v1 = vld [vmem:[%s1989_s1 + $0x18] sm:$0xff]  ;;  %v28_v4 = vld [vmem:[%s1989_s1] sm:$0xff]  ;;  %635 = vst.msk [vmem:[#allocation2] sm:$0xff] %vm48_vm0, %v1644_v36 }
   0x2   :  { %v1354_v2 = vld [vmem:[%s1990_s0 + $0x8] ss:$2 sm:$0xff]  ;;  %v1573_v3 = vpack.c.bf16 %v47_v1, %v46_v0  ;;  %v1355_v7 = vld [vmem:[%s1990_s0 + $0x18] ss:$2 sm:$0xff]  ;;  %v1346_v17 = vld [vmem:[%s1990_s0 + $0x7] ss:$2 sm:$0xff] }
   0x3   :  { %1478 = vmatprep.mubr.msk.f32.mxu0 %vm48_vm0, %v1354_v2  ;;  %v29_v5 = vld [vmem:[%s1989_s1 + $0x8] sm:$0xff]  ;;  %v323_v8 = vld [vmem:[%s1989_s1 + $0x20] sm:$0xff]  ;;  %v663_v34 = vld [vmem:[%s1989_s1 + $0x50] sm:$0xff]  ;;  %1065 = vst.msk [vmem:[#allocation3] sm:$0xff] %vm48_vm0, %v1644_v36  ;;  %v1791_v43 = vshrl.u32 %v462_v42, 7 }
   0x4   :  { %v1577_v6 = vpack.c.bf16 %v29_v5, %v28_v4  ;;  %1574 = vmatprep.subr.bf16.mxu0 %v1573_v3  ;;  %1609 = vmatprep.subr.bf16.mxu1 %v1573_v3  ;;  %v324_v9 = vld [vmem:[%s1989_s1 + $0x28] sm:$0xff]  ;;  %v1357_v12 = vld [vmem:[%s1990_s0 + $0x38] ss:$2 sm:$0xff]  ;;  %v1347_v18 = vld [vmem:[%s1990_s0 + $0x17] ss:$2 sm:$0xff] }
   0x5   :  { %1576 = vmatpush3.bf16.msra.mxu0 %v1573_v3  ;;  %1610 = vmatpush3.bf16.msra.mxu1 %v1573_v3  ;;  %v1356_v10 = vld [vmem:[%s1990_s0 + $0x28] ss:$2 sm:$0xff]  ;;  %v1581_v11 = vpack.c.bf16 %v324_v9, %v323_v8  ;;  %v1361_v15 = vld [vmem:[%s1990_s0 + $0x78] ss:$2 sm:$0xff]  ;;  %v1348_v19 = vld [vmem:[%s1990_s0 + $0x27] ss:$2 sm:$0xff] }
   0x6   :  { %1578 = vmatprep.subr.bf16.mxu0 %v1577_v6  ;;  %v1360_v13 = vld [vmem:[%s1990_s0 + $0x68] ss:$2 sm:$0xff]  ;;  %v1359_v16 = vld [vmem:[%s1990_s0 + $0x58] ss:$2 sm:$0xff]  ;;  %v1349_v20 = vld [vmem:[%s1990_s0 + $0x37] ss:$2 sm:$0xff] }
   0x7   :  { %v1358_v14 = vld [vmem:[%s1990_s0 + $0x48] ss:$2 sm:$0xff]  ;;  %1487 = vmatprep.mubr.msk.f32.mxu1 %vm48_vm0, %v1360_v13  ;;  %v1350_v21 = vld [vmem:[%s1990_s0 + $0x47] ss:$2 sm:$0xff]  ;;  %v1351_v22 = vld [vmem:[%s1990_s0 + $0x57] ss:$2 sm:$0xff] }
   0x8   :  { %1479 = vmatmul.mubr.msk.f32.vlgmr.msra.gmra.mrb[0].mxu0 %vm48_vm0, %v1355_v7  ;;  %1488 = vmatmul.mubr.msk.f32.vlgmr.msra.gmra.mrb[0].mxu1 %vm48_vm0, %v1361_v15  ;;  %v1352_v23 = vld [vmem:[%s1990_s0 + $0x67] ss:$2 sm:$0xff]  ;;  %v1353_v24 = vld [vmem:[%s1990_s0 + $0x77] ss:$2 sm:$0xff]  ;;  %v1794_v44 = vadd.s32 24, %v1791_v43  ;;  %v470_v57 = vadd.s32 56, %v1791_v43 }
   0x9   :  { %1580 = vmatpush3.bf16.msra.mxu0 %v1577_v6  ;;  %1481 = vmatprep.mubr.msk.f32.mxu0 %vm48_vm0, %v1356_v10  ;;  %v1378_v25 = vld [vmem:[%s1990_s0 + $0x9] ss:$2 sm:$0xff]  ;;  %v1379_v26 = vld [vmem:[%s1990_s0 + $0x19] ss:$2 sm:$0xff] }
   0xa   :  { %1582 = vmatprep.subr.bf16.mxu0 %v1581_v11  ;;  %v1380_v27 = vld [vmem:[%s1990_s0 + $0x29] ss:$2 sm:$0xff]  ;;  %v1381_v28 = vld [vmem:[%s1990_s0 + $0x39] ss:$2 sm:$0xff]  ;;  %v474_v45 = vand.u32 31, %v1794_v44  ;;  %v478_v4 = vand.u32 31, %v470_v57 }
   0xb   :  { %v1382_v29 = vld [vmem:[%s1990_s0 + $0x49] ss:$2 sm:$0xff]  ;;  %v1383_v30 = vld [vmem:[%s1990_s0 + $0x59] ss:$2 sm:$0xff] }
   0xc   :  { %1482 = vmatmul.mubr.msk.f32.gmra.mrb[2].mxu0 %vm48_vm0, %v1357_v12  ;;  %v1384_v31 = vld [vmem:[%s1990_s0 + $0x69] ss:$2 sm:$0xff]  ;;  %v1385_v32 = vld [vmem:[%s1990_s0 + $0x79] ss:$2 sm:$0xff]  ;;  %vm1809_vm1 = vcmp.lt.s32.totalorder %v474_v45, 25  ;;  %vm1840_vm2 = vcmp.lt.s32.totalorder %v478_v4, 25 }
   0xd   :  { %1484 = vmatprep.mubr.msk.f32.mxu0 %vm48_vm0, %v1358_v14  ;;  %v662_v33 = vld [vmem:[%s1989_s1 + $0x48] sm:$0xff]  ;;  %v652_v37 = vld [vmem:[%s1989_s1 + $0x38] sm:$0xff]  ;;  %v653_v38 = vld [vmem:[%s1989_s1 + $0x40] sm:$0xff]  ;;  %v589_v4 = vsub.s32 1, %v1791_v43 }
   0xe   :  { %v1585_v35 = vpack.c.bf16 %v663_v34, %v662_v33  ;;  %v1788_v39 = vpack.c.bf16 %v653_v38, %v652_v37  ;;  %v866_v52 = vld [vmem:[%s1989_s1 + $0x58] sm:$0xff] }
  0x10   :  { %1485 = vmatmul.mubr.msk.f32.gmra.mrb[4].mxu0 %vm48_vm0, %v1359_v16  ;;  %1586 = vmatprep.subr.bf16.mxu1 %v1585_v35 }
  0x11   :  { %1494 = vmatprep.mubr.msk.f32.mxu0 %vm48_vm0, %v1346_v17  ;;  %1588 = vmatpush3.bf16.msra.mxu1 %v1585_v35 }
  0x12   :  { %1590 = vmatprep.subr.bf16.mxu1 %v1788_v39 }
  0x14   :  { %1495 = vmatmul.mubr.msk.f32.vlgmr.msra.gmra.mrb[0].mxu0 %vm48_vm0, %v1347_v18 }
  0x15   :  { %1584 = vmatpush3.bf16.msra.mxu0 %v1581_v11  ;;  %1497 = vmatprep.mubr.msk.f32.mxu0 %vm48_vm0, %v1348_v19 }
  0x18   :  { %1498 = vmatmul.mubr.msk.f32.gmra.mrb[2].mxu0 %vm48_vm0, %v1349_v20 }
  0x19   :  { %1500 = vmatprep.mubr.msk.f32.mxu0 %vm48_vm0, %v1350_v21 }
  0x1c   :  { %1501 = vmatmul.mubr.msk.f32.gmra.mrb[4].mxu0 %vm48_vm0, %v1351_v22 }
  0x1d   :  { %1503 = vmatprep.mubr.msk.f32.mxu0 %vm48_vm0, %v1352_v23 }
  0x20   :  { %1504 = vmatmul.mubr.msk.f32.gmra.mrb[6].mxu0 %vm48_vm0, %v1353_v24 }
  0x21   :  { %1510 = vmatprep.mubr.msk.f32.mxu0 %vm48_vm0, %v1378_v25 }
  0x24   :  { %1511 = vmatmul.mubr.msk.f32.vlgmr.msra.gmra.mrb[0].mxu0 %vm48_vm0, %v1379_v26 }
  0x25   :  { %1513 = vmatprep.mubr.msk.f32.mxu0 %vm48_vm0, %v1380_v27 }
  0x28   :  { %1514 = vmatmul.mubr.msk.f32.gmra.mrb[2].mxu0 %vm48_vm0, %v1381_v28 }
  0x29   :  { %1516 = vmatprep.mubr.msk.f32.mxu0 %vm48_vm0, %v1382_v29 }
  0x2c   :  { %1517 = vmatmul.mubr.msk.f32.gmra.mrb[4].mxu0 %vm48_vm0, %v1383_v30 }
  0x2d   :  { %1519 = vmatprep.mubr.msk.f32.mxu0 %vm48_vm0, %v1384_v31 }
  0x30   :  { %1520 = vmatmul.mubr.msk.f32.gmra.mrb[6].mxu0 %vm48_vm0, %v1385_v32 }
  0xdb   :  { %v1489_v40 = vpop.f32.mrb[0].mxu1 }
  0xdc   :  { %v169_v41 = vpop.f32.mrb[1].mxu1 }
  0xf7   :  { %v1797_v46 = vpop.f32.mrb[0].mxu0 }
  0xf8   :  { %v512_v47 = vsel %vm48_vm0, %v1797_v46, 0.0  ;;  %v533_v48 = vmul.f32 %v1797_v46, %v1797_v46  ;;  %v1803_v49 = vpop.f32.mrb[1].mxu0 }
  0xf9   :  { %v511_v50 = vsel %vm48_vm0, %v1803_v49, 0.0  ;;  %v532_v51 = vmul.f32 %v1803_v49, %v1803_v49 }
  0xfa   :  { %v541_v53 = vsel %vm48_vm0, %v533_v48, 0.0  ;;  %v513_v54 = vadd.f32 %v512_v47, %v511_v50 }
  0xfb   :  { %v540_v55 = vsel %vm48_vm0, %v532_v51, 0.0  ;;  %v1515_v56 = vpop.f32.mrb[2].mxu0 }
  0xfc   :  { %v542_v58 = vadd.f32 %v541_v53, %v540_v55  ;;  %v1818_v59 = vsel %vm1809_vm1, %v1515_v56, 0.0  ;;  %v1820_v60 = vpop.f32.mrb[3].mxu0 }
  0xfd   :  { %v535_v61 = vmul.f32 %v1818_v59, %v1818_v59  ;;  %v514_v62 = vsel %vm48_vm0, %v1820_v60, 0.0  ;;  %v534_v63 = vmul.f32 %v1820_v60, %v1820_v60  ;;  %v516_v1 = vsel %vm48_vm0, %v1818_v59, 0.0 }
  0xfe   :  { %v515_v0 = vadd.f32 %v514_v62, %v513_v54  ;;  %v577_v62 = vsub.s32 0, %v1791_v43 }
  0xff   :  { %v543_v2 = vsel %vm48_vm0, %v534_v63, 0.0  ;;  %v1831_v3 = vpop.f32.mrb[4].mxu0  ;;  %v545_v8 = vsel %vm48_vm0, %v535_v61, 0.0  ;;  %v566_v61 = vld [vmem:[%s1989_s1 + $0x30] sm:$0x3] }
 0x100   :  { %v544_v5 = vadd.f32 %v543_v2, %v542_v58  ;;  %v435_v6 = vpop.f32.mrb[5].mxu0  ;;  %v517_v7 = vadd.f32 %v516_v1, %v515_v0  ;;  %v537_v9 = vmul.f32 %v1831_v3, %v1831_v3  ;;  %v520_v14 = vsel %vm48_vm0, %v1831_v3, 0.0 }
 0x101   :  { %v518_v10 = vsel %vm48_vm0, %v435_v6, 0.0  ;;  %v536_v11 = vmul.f32 %v435_v6, %v435_v6 }
 0x102   :  { %v519_v12 = vadd.f32 %v518_v10, %v517_v7  ;;  %v546_v13 = vadd.f32 %v545_v8, %v544_v5  ;;  %v549_v22 = vsel %vm48_vm0, %v537_v9, 0.0 }
 0x103   :  { %v547_v15 = vsel %vm48_vm0, %v536_v11, 0.0  ;;  %v1521_v16 = vpop.f32.mrb[6].mxu0 }
 0x104   :  { %v521_v18 = vadd.f32 %v520_v14, %v519_v12  ;;  %v548_v19 = vadd.f32 %v547_v15, %v546_v13  ;;  %v1611_v20 = vadd.f32 %v1521_v16, %v1489_v40  ;;  %v445_v21 = vpop.f32.mrb[7].mxu0 }
 0x105   :  { %v1612_v23 = vadd.f32 %v445_v21, %v169_v41 }
 0x106   :  { %v550_v24 = vadd.f32 %v549_v22, %v548_v19  ;;  %v510_v25 = vsel %vm1840_vm2, %v1611_v20, 0.0 }
 0x107   :  { %v539_v26 = vmul.f32 %v510_v25, %v510_v25  ;;  %v522_v27 = vsel %vm48_vm0, %v1612_v23, 0.0  ;;  %v538_v28 = vmul.f32 %v1612_v23, %v1612_v23  ;;  %v524_v30 = vsel %vm48_vm0, %v510_v25, 0.0 }
 0x108   :  { %v523_v29 = vadd.f32 %v522_v27, %v521_v18  ;;  %v1868_v18 = vld [vmem:[%s1989_s1 + $0xa8] ss:$0 sm:$0xff] }
 0x109   :  { %v551_v31 = vsel %vm48_vm0, %v538_v28, 0.0  ;;  %v553_v34 = vsel %vm48_vm0, %v539_v26, 0.0 }
 0x10a   :  { %v525_v32 = vadd.f32 %v524_v30, %v523_v29  ;;  %v552_v33 = vadd.f32 %v551_v31, %v550_v24 }
 0x10c   :  { %v526_v35 = vrot.slane %v525_v32, 4  ;;  %v554_v36 = vadd.f32 %v553_v34, %v552_v33 }
 0x10e   :  { %v527_v37 = vadd.f32 %v526_v35, %v525_v32  ;;  %v555_v38 = vrot.slane %v554_v36, 4 }
 0x110   :  { %v528_v40 = vrot.slane %v527_v37, 2  ;;  %v556_v41 = vadd.f32 %v555_v38, %v554_v36 }
 0x112   :  { %v529_v42 = vadd.f32 %v528_v40, %v527_v37  ;;  %v557_v45 = vrot.slane %v556_v41, 2  ;;  %v867_v40 = vld [vmem:[%s1989_s1 + $0x60] sm:$0xff] }
 0x114   :  { %v530_v47 = vrot.slane %v529_v42, 1  ;;  %v558_v48 = vadd.f32 %v557_v45, %v556_v41 }
 0x116   :  { %v531_v50 = vadd.f32 %v530_v47, %v529_v42  ;;  %v559_v51 = vrot.slane %v558_v48, 1  ;;  %v1593_v42 = vpack.c.bf16 %v867_v40, %v866_v52 }
 0x118   :  { %v560_v53 = vadd.f32 %v559_v51, %v558_v48  ;;  %v562_v54 = vmul.f32 0.02, %v531_v50 }
 0x11a   :  { %v563_v55 = vmul.f32 0.02, %v560_v53  ;;  %v564_v56 = vmul.f32 %v562_v54, %v562_v54 }
 0x11c   :  { %v565_v57 = vsub.f32 %v563_v55, %v564_v56 }
 0x11e   :  { %v567_v58 = vadd.f32 1e-05, %v565_v57  ;;  %v1080_v57 = vld [vmem:[%s1989_s1 + $0x80] sm:$0xff] }
 0x120   :  { %1640 = vrsqrt.f32 %v567_v58  ;;  %v1081_v58 = vld [vmem:[%s1989_s1 + $0x88] sm:$0xff] }
 0x12a   :  { %v1641_v63 = vpop.eup %1640 }
 0x12b   :  { %v569_v0 = vmul.f32 %v1641_v63, %v566_v61  ;;  %v1074_v63 = vld [vmem:[%s1989_s1 + $0x70] sm:$0xff] }
 0x12d   :  { %v570_v1 = vmul.f32 %v569_v0, %v562_v54  ;;  %v578_v2 = vrot.slane %v569_v0, %v577_v62  ;;  %v1075_v0 = vld [vmem:[%s1989_s1 + $0x78] sm:$0xff] }
 0x12f   :  { %v572_v5 = vrot.slane %v570_v1, 7  ;;  %v585_v7 = vmul.f32 %v1612_v23, %v578_v2  ;;  %v579_v8 = vmul.f32 %v578_v2, %v1803_v49  ;;  %v580_v9 = vmul.f32 %v1797_v46, %v578_v2 }
 0x130   :  { %v581_v10 = vmul.f32 %v578_v2, %v1820_v60  ;;  %v582_v11 = vmul.f32 %v578_v2, %v1818_v59  ;;  %v583_v12 = vmul.f32 %v578_v2, %v435_v6  ;;  %v584_v13 = vmul.f32 %v1831_v3, %v578_v2 }
 0x131   :  { %v574_v14 = vsub.f32 %v566_v61, %v572_v5  ;;  %v586_v15 = vmul.f32 %v578_v2, %v510_v25  ;;  %v1597_v61 = vpack.c.bf16 %v1081_v58, %v1080_v57  ;;  %v1921_v1 = vpack.c.bf16 %v1075_v0, %v1074_v63 }
 0x132   :  { %v464_v2 = vadd.s32 8, %v1791_v43 }
 0x133   :  { %v590_v16 = vrot.slane %v574_v14, %v589_v4 }
 0x134   :  { %v970_v5 = vand.u32 15, %v464_v2 }
 0x135   :  { %v597_v49 = vadd.f32 %v590_v16, %v585_v7  ;;  %v591_v19 = vadd.f32 %v590_v16, %v579_v8  ;;  %v592_v46 = vadd.f32 %v590_v16, %v580_v9  ;;  %v593_v20 = vadd.f32 %v590_v16, %v581_v10  ;;  %v1249_v8 = vld [vmem:[%s1989_s1 + $0x98] sm:$0xff] }
 0x136   :  { %v594_v60 = vadd.f32 %v590_v16, %v582_v11  ;;  %v595_v21 = vadd.f32 %v590_v16, %v583_v12  ;;  %v596_v59 = vadd.f32 %v590_v16, %v584_v13  ;;  %v598_v6 = vadd.f32 %v590_v16, %v586_v15 }
 0x137   :  { %vm605_vm3 = vcmp.gt.f32.partialorder %v597_v49, 0.0  ;;  %v617_v3 = vmul.f32 %v1868_v18, %v597_v49  ;;  %vm599_vm4 = vcmp.gt.f32.partialorder %v591_v19, 0.0  ;;  %vm600_vm5 = vcmp.gt.f32.partialorder %v592_v46, 0.0 }
 0x138   :  { %v611_v22 = vmul.f32 %v1868_v18, %v591_v19  ;;  %v612_v23 = vmul.f32 %v1868_v18, %v592_v46  ;;  %vm601_vm6 = vcmp.gt.f32.partialorder %v593_v20, 0.0  ;;  %vm602_vm7 = vcmp.gt.f32.partialorder %v594_v60, 0.0 }
 0x139   :  { %v625_v24 = vsel %vm605_vm3, %v597_v49, %v617_v3  ;;  %v613_v25 = vmul.f32 %v1868_v18, %v593_v20  ;;  %v614_v26 = vmul.f32 %v1868_v18, %v594_v60  ;;  %vm603_vm8 = vcmp.gt.f32.partialorder %v595_v21, 0.0 }
 0x13a   :  { %642 = vst.msk [vmem:[#allocation2 + $0x38] sm:$0xff] %vm48_vm0, %v625_v24  ;;  %v619_v27 = vsel %vm599_vm4, %v591_v19, %v611_v22  ;;  %v620_v28 = vsel %vm600_vm5, %v592_v46, %v612_v23  ;;  %vm604_vm9 = vcmp.gt.f32.partialorder %v596_v59, 0.0  ;;  %v615_v29 = vmul.f32 %v1868_v18, %v595_v21 }
 0x13b   :  { %636 = vst.msk [vmem:[#allocation2 + $0x8] sm:$0xff] %vm48_vm0, %v619_v27  ;;  %637 = vst.msk [vmem:[#allocation2 + $0x10] sm:$0xff] %vm48_vm0, %v620_v28  ;;  %v621_v30 = vsel %vm601_vm6, %v593_v20, %v613_v25  ;;  %v622_v31 = vsel %vm602_vm7, %v594_v60, %v614_v26  ;;  %v616_v32 = vmul.f32 %v1868_v18, %v596_v59  ;;  %vm606_vm10 = vcmp.gt.f32.partialorder %v598_v6, 0.0 }
 0x13c   :  { %v630_v33 = vsel %vm1809_vm1, %v622_v31, 0.0  ;;  %638 = vst.msk [vmem:[#allocation2 + $0x18] sm:$0xff] %vm48_vm0, %v621_v30  ;;  %v623_v34 = vsel %vm603_vm8, %v595_v21, %v615_v29  ;;  %v618_v35 = vmul.f32 %v1868_v18, %v598_v6  ;;  %v972_v7 = vand.u32 15, %v1794_v44 }
 0x13d   :  { %639 = vst.msk [vmem:[#allocation2 + $0x20] sm:$0xff] %vm48_vm0, %v630_v33  ;;  %v624_v36 = vsel %vm604_vm9, %v596_v59, %v616_v32  ;;  %640 = vst.msk [vmem:[#allocation2 + $0x28] sm:$0xff] %vm48_vm0, %v623_v34  ;;  %vm1926_vm11 = vcmp.lt.s32.totalorder %v970_v5, 13 }
 0x13e   :  { %641 = vst.msk [vmem:[#allocation2 + $0x30] sm:$0xff] %vm48_vm0, %v624_v36  ;;  %v626_v37 = vsel %vm606_vm10, %v598_v6, %v618_v35  ;;  %vm1932_vm12 = vcmp.lt.s32.totalorder %v972_v7, 13 }
 0x13f   :  { %v634_v38 = vsel %vm1840_vm2, %v626_v37, 0.0 }
 0x140   :  { %643 = vst.msk [vmem:[#allocation2 + $0x40] sm:$0xff] %vm48_vm0, %v634_v38 }
 0x142   :  { %v655_v41 = vld [vmem:[#allocation2 + $0x8] ss:$2 sm:$0xff]  ;;  %v645_v48 = vld [vmem:[#allocation2 + $0x7] ss:$2 sm:$0xff] }
 0x143   :  { %1526 = vmatprep.mubr.msk.f32.mxu1 %vm48_vm0, %v655_v41  ;;  %v859_v54 = vld [vmem:[#allocation2 + $0x9] ss:$2 sm:$0xff] }
 0x144   :  { %v657_v45 = vld [vmem:[#allocation2 + $0x18] ss:$2 sm:$0xff]  ;;  %v647_v50 = vld [vmem:[#allocation2 + $0x17] ss:$2 sm:$0xff] }
 0x145   :  { %1527 = vmatmul.mubr.msk.f32.vlgmr.msra.gmra.mrb[2].mxu1 %vm48_vm0, %v657_v45  ;;  %v659_v47 = vld [vmem:[#allocation2 + $0x28] ss:$2 sm:$0xff]  ;;  %v649_v51 = vld [vmem:[#allocation2 + $0x27] ss:$2 sm:$0xff] }
 0x146   :  { %1529 = vmatprep.mubr.msk.f32.mxu1 %vm48_vm0, %v659_v47  ;;  %1592 = vmatpush3.bf16.msra.mxu1 %v1788_v39  ;;  %v861_v39 = vld [vmem:[#allocation2 + $0x19] ss:$2 sm:$0xff]  ;;  %v863_v55 = vld [vmem:[#allocation2 + $0x29] ss:$2 sm:$0xff] }
 0x147   :  { %1594 = vmatprep.subr.bf16.mxu1 %v1593_v42  ;;  %v661_v17 = vld [vmem:[#allocation2 + $0x38] ss:$2 sm:$0xff]  ;;  %v651_v53 = vld [vmem:[#allocation2 + $0x37] ss:$2 sm:$0xff] }
 0x148   :  { %v865_v56 = vld [vmem:[#allocation2 + $0x39] ss:$2 sm:$0xff] }
 0x149   :  { %1530 = vmatmul.mubr.msk.f32.gmra.mrb[4].mxu1 %vm48_vm0, %v661_v17 }
 0x14a   :  { %1536 = vmatprep.mubr.msk.f32.mxu1 %vm48_vm0, %v645_v48  ;;  %v1024_v48 = vld [vmem:[%s1989_s1 + $0x68] sm:$0x3] }
 0x14d   :  { %1537 = vmatmul.mubr.msk.f32.vlgmr.msra.gmra.mrb[2].mxu1 %vm48_vm0, %v647_v50 }
 0x14e   :  { %1539 = vmatprep.mubr.msk.f32.mxu1 %vm48_vm0, %v649_v51  ;;  %1596 = vmatpush3.bf16.msra.mxu1 %v1593_v42 }
 0x14f   :  { %1598 = vmatprep.subr.bf16.mxu1 %v1597_v61 }
 0x151   :  { %1540 = vmatmul.mubr.msk.f32.gmra.mrb[4].mxu1 %vm48_vm0, %v651_v53 }
 0x152   :  { %1546 = vmatprep.mubr.msk.f32.mxu1 %vm48_vm0, %v859_v54 }
 0x155   :  { %1547 = vmatmul.mubr.msk.f32.vlgmr.msra.gmra.mrb[2].mxu1 %vm48_vm0, %v861_v39 }
 0x156   :  { %1549 = vmatprep.mubr.msk.f32.mxu1 %vm48_vm0, %v863_v55  ;;  %1600 = vmatpush3.bf16.msra.mxu1 %v1597_v61 }
 0x157   :  { %1602 = vmatprep.subr.bf16.mxu1 %v1921_v1 }
 0x159   :  { %1550 = vmatmul.mubr.msk.f32.gmra.mrb[4].mxu1 %vm48_vm0, %v865_v56 }
 0x228   :  { %v1548_v9 = vpop.f32.mrb[2].mxu1 }
 0x229   :  { %v986_v10 = vsel %vm1926_vm11, %v1548_v9, 0.0  ;;  %v946_v11 = vpop.f32.mrb[3].mxu1 }
 0x22a   :  { %v990_v13 = vsel %vm48_vm0, %v986_v10, 0.0  ;;  %v1003_v14 = vmul.f32 %v986_v10, %v986_v10  ;;  %v989_v15 = vsel %vm48_vm0, %v946_v11, 0.0  ;;  %v1002_v16 = vmul.f32 %v946_v11, %v946_v11 }
 0x22b   :  { %v991_v44 = vadd.f32 %v990_v13, %v989_v15 }
 0x22c   :  { %v1007_v49 = vsel %vm48_vm0, %v1003_v14, 0.0  ;;  %v1006_v19 = vsel %vm48_vm0, %v1002_v16, 0.0  ;;  %v1551_v46 = vpop.f32.mrb[4].mxu1 }
 0x22d   :  { %v1008_v20 = vadd.f32 %v1007_v49, %v1006_v19  ;;  %v988_v60 = vsel %vm1932_vm12, %v1551_v46, 0.0  ;;  %v956_v21 = vpop.f32.mrb[5].mxu1 }
 0x22e   :  { %v1005_v59 = vmul.f32 %v988_v60, %v988_v60  ;;  %v992_v6 = vsel %vm48_vm0, %v956_v21, 0.0  ;;  %v1004_v3 = vmul.f32 %v956_v21, %v956_v21  ;;  %v994_v23 = vsel %vm48_vm0, %v988_v60, 0.0 }
 0x22f   :  { %v993_v22 = vadd.f32 %v992_v6, %v991_v44 }
 0x230   :  { %v1009_v24 = vsel %vm48_vm0, %v1004_v3, 0.0  ;;  %v1011_v27 = vsel %vm48_vm0, %v1005_v59, 0.0 }
 0x231   :  { %v995_v25 = vadd.f32 %v994_v23, %v993_v22  ;;  %v1010_v26 = vadd.f32 %v1009_v24, %v1008_v20 }
 0x233   :  { %v996_v28 = vrot.slane %v995_v25, 4  ;;  %v1012_v29 = vadd.f32 %v1011_v27, %v1010_v26 }
 0x235   :  { %v997_v30 = vadd.f32 %v996_v28, %v995_v25  ;;  %v1013_v31 = vrot.slane %v1012_v29, 4 }
 0x237   :  { %v998_v32 = vrot.slane %v997_v30, 2  ;;  %v1014_v33 = vadd.f32 %v1013_v31, %v1012_v29 }
 0x239   :  { %v999_v34 = vadd.f32 %v998_v32, %v997_v30  ;;  %v1015_v35 = vrot.slane %v1014_v33, 2 }
 0x23b   :  { %v1000_v36 = vrot.slane %v999_v34, 1  ;;  %v1016_v37 = vadd.f32 %v1015_v35, %v1014_v33 }
 0x23d   :  { %v1001_v38 = vadd.f32 %v1000_v36, %v999_v34  ;;  %v1017_v52 = vrot.slane %v1016_v37, 1 }
 0x23f   :  { %v1018_v40 = vadd.f32 %v1017_v52, %v1016_v37  ;;  %v1020_v41 = vmul.f32 0.03846154, %v1001_v38 }
 0x241   :  { %v1021_v42 = vmul.f32 0.03846154, %v1018_v40  ;;  %v1022_v45 = vmul.f32 %v1020_v41, %v1020_v41 }
 0x243   :  { %v1023_v47 = vsub.f32 %v1021_v42, %v1022_v45 }
 0x245   :  { %v1025_v17 = vadd.f32 1e-05, %v1023_v47 }
 0x247   :  { %1642 = vrsqrt.f32 %v1025_v17 }
 0x251   :  { %v1643_v50 = vpop.eup %1642 }
 0x252   :  { %v1027_v51 = vmul.f32 %v1643_v50, %v1024_v48 }
 0x254   :  { %v1028_v53 = vmul.f32 %v1027_v51, %v1020_v41  ;;  %v1036_v54 = vrot.slane %v1027_v51, %v577_v62 }
 0x256   :  { %v1030_v39 = vrot.slane %v1028_v53, 7  ;;  %v1037_v55 = vmul.f32 %v1036_v54, %v946_v11  ;;  %v1038_v56 = vmul.f32 %v1036_v54, %v986_v10  ;;  %v1039_v57 = vmul.f32 %v1036_v54, %v956_v21  ;;  %v1413_v21 = vld [vmem:[%s1989_s1 + $0xa0] ss:$0 sm:$0xff] }
 0x257   :  { %v1040_v58 = vmul.f32 %v1036_v54, %v988_v60 }
 0x258   :  { %v1032_v61 = vsub.f32 %v1024_v48, %v1030_v39 }
 0x25a   :  { %v1044_v63 = vrot.slane %v1032_v61, %v589_v4 }
 0x25c   :  { %v1045_v0 = vadd.f32 %v1044_v63, %v1037_v55  ;;  %v1046_v2 = vadd.f32 %v1044_v63, %v1038_v56  ;;  %v1047_v5 = vadd.f32 %v1044_v63, %v1039_v57  ;;  %v1048_v7 = vadd.f32 %v1044_v63, %v1040_v58 }
 0x25e   :  { %vm1049_vm13 = vcmp.gt.f32.partialorder %v1045_v0, 0.0  ;;  %vm1050_vm14 = vcmp.gt.f32.partialorder %v1046_v2, 0.0  ;;  %vm1051_vm15 = vcmp.gt.f32.partialorder %v1047_v5, 0.0  ;;  %vm1052_vm1 = vcmp.gt.f32.partialorder %v1048_v7, 0.0 }
 0x25f   :  { %v1053_v9 = vmul.f32 %v1868_v18, %v1045_v0  ;;  %v1054_v62 = vmul.f32 %v1868_v18, %v1046_v2  ;;  %v1055_v10 = vmul.f32 %v1868_v18, %v1047_v5  ;;  %v1056_v11 = vmul.f32 %v1868_v18, %v1048_v7  ;;  %v1248_v18 = vld [vmem:[%s1989_s1 + $0x90] sm:$0xff] }
 0x260   :  { %v1605_v12 = vpack.c.bf16 %v1249_v8, %v1248_v18 }
 0x261   :  { %v1057_v13 = vsel %vm1049_vm13, %v1045_v0, %v1053_v9  ;;  %v1058_v14 = vsel %vm1050_vm14, %v1046_v2, %v1054_v62  ;;  %v1059_v43 = vsel %vm1051_vm15, %v1047_v5, %v1055_v10  ;;  %v1060_v4 = vsel %vm1052_vm1, %v1048_v7, %v1056_v11 }
 0x262   :  { %v1062_v15 = vsel %vm1926_vm11, %v1058_v14, 0.0  ;;  %v1064_v16 = vsel %vm1932_vm12, %v1060_v4, 0.0  ;;  %1066 = vst.msk [vmem:[#allocation3 + $0x8] sm:$0xff] %vm48_vm0, %v1057_v13  ;;  %1068 = vst.msk [vmem:[#allocation3 + $0x18] sm:$0xff] %vm48_vm0, %v1059_v43 }
 0x263   :  { %1067 = vst.msk [vmem:[#allocation3 + $0x10] sm:$0xff] %vm48_vm0, %v1062_v15  ;;  %1069 = vst.msk [vmem:[#allocation3 + $0x20] sm:$0xff] %vm48_vm0, %v1064_v16 }
 0x26a   :  { %v1077_v44 = vld [vmem:[#allocation3 + $0x8] ss:$2 sm:$0xff]  ;;  %v1079_v49 = vld [vmem:[#allocation3 + $0x18] ss:$2 sm:$0xff]  ;;  %v1071_v19 = vld [vmem:[#allocation3 + $0x7] ss:$2 sm:$0xff] }
 0x26b   :  { %1556 = vmatprep.mubr.msk.f32.mxu1 %vm48_vm0, %v1077_v44  ;;  %v1073_v46 = vld [vmem:[#allocation3 + $0x17] ss:$2 sm:$0xff] }
 0x26c   :  { %1557 = vmatmul.mubr.msk.f32.vlgmr.msra.gmra.mrb[6].mxu1 %vm48_vm0, %v1079_v49  ;;  %v1245_v20 = vld [vmem:[#allocation3 + $0x9] ss:$2 sm:$0xff]  ;;  %v1247_v60 = vld [vmem:[#allocation3 + $0x19] ss:$2 sm:$0xff] }
 0x26d   :  { %1604 = vmatpush3.bf16.msra.mxu1 %v1921_v1  ;;  %1563 = vmatprep.mubr.msk.f32.mxu1 %vm48_vm0, %v1071_v19 }
 0x26e   :  { %1606 = vmatprep.subr.bf16.mxu1 %v1605_v12 }
 0x274   :  { %1564 = vmatmul.mubr.msk.f32.vlgmr.msra.gmra.mrb[6].mxu1 %vm48_vm0, %v1073_v46 }
 0x275   :  { %1608 = vmatpush3.bf16.msra.mxu1 %v1605_v12  ;;  %1570 = vmatprep.mubr.msk.f32.mxu1 %vm48_vm0, %v1245_v20 }
 0x27c   :  { %1571 = vmatmul.mubr.msk.f32.vlgmr.msra.gmra.mrb[6].mxu1 %vm48_vm0, %v1247_v60 }
 0x34f   :  { %v1572_v59 = vpop.f32.mrb[6].mxu1 }
 0x350   :  { %v1339_v6 = vadd.f32 %v1572_v59, %v1413_v21  ;;  %v1322_v1 = vpop.f32.mrb[7].mxu1 }
 0x351   :  { %v1338_v3 = vadd.f32 %v1413_v21, %v1322_v1 }
 0x352   :  { %1341 = vst.msk [vmem:[%s1991_s2 + $0x8] sm:$0xff] %vm48_vm0, %v1339_v6 }
 0x353   :  { %1340 = vst.msk [vmem:[%s1991_s2] sm:$0xff] %vm48_vm0, %v1338_v3 }

</bundles_post_ra>
